<compile_context>
chip_gen: v5e
topology: v5e:2x2
jax: 0.10.0
libtpu: 0.0.40
codegen_flags: <defaults>
</compile_context>

<pallas_src>
import jax
import jax.numpy as jnp
from jax.experimental import pallas as pl
from jax.experimental.pallas import tpu as pltpu


_LANE = 128
_TARGET_STEP_BYTES = 4 << 20     # single-copy (x + out) bytes per grid step
_SMALL_CHANNELS = 16             # <= this on both sides -> VPU/SMEM path


def _mask_head_mxu_kernel(w_ref, b_ref, x_ref, o_ref):
    """MXU path: per-image (C_out, C_in) @ (C_in, T) + bias (f32 accumulate)."""
    w = w_ref[...]
    b = b_ref[...]                                    # (C_out, 1)
    block_n = x_ref.shape[0]
    for i in range(block_n):                          # small static unroll
        y = jnp.dot(w, x_ref[i], preferred_element_type=jnp.float32)
        o_ref[i] = (y + b).astype(o_ref.dtype)


def _mask_head_vpu_kernel(w_ref, b_ref, x_ref, o_ref):
    """VPU path for tiny channel counts: unrolled scalar-broadcast FMAs.

    w_ref / b_ref are SMEM-resident; each w_ref[o, c] read is a scalar splat,
    so the whole computation stays on the VALU (f32, safe on v5e's no-bf16 VPU)
    and co-issues with the streaming DMAs.
    """
    c_out, c_in = w_ref.shape
    x = x_ref[...].astype(jnp.float32)                # (block_n, C_in, T)
    outs = []
    for o in range(c_out):
        acc = x[:, 0, :] * w_ref[o, 0] + b_ref[o]
        for c in range(1, c_in):
            acc = acc + x[:, c, :] * w_ref[o, c]
        outs.append(acc)
    o_ref[...] = jnp.stack(outs, axis=1).astype(o_ref.dtype)


def _choose_tiling(n, c_in, c_out, hw, itemsize):
    """Pick (block_n, tile_hw, grid) against the full per-step footprint."""
    per_pos = (c_in + c_out) * itemsize               # x + out bytes / position
    cap_hw = max(_LANE, _TARGET_STEP_BYTES // max(1, per_pos))
    if hw <= cap_hw:
        tile_hw = hw                                  # full extent: always legal
    else:
        tile_hw = (cap_hw // _LANE) * _LANE           # 128-multiple, cdiv grid
    grid_hw = pl.cdiv(hw, tile_hw)

    per_img = (c_in + c_out) * tile_hw * itemsize
    block_n = max(1, min(n, _TARGET_STEP_BYTES // max(1, per_img)))
    # v7x megacore: keep at least 2 grid steps when there is more than 1 image.
    if grid_hw * pl.cdiv(n, block_n) < 2 and n > 1:
        block_n = -(-n // 2)                          # ceil(n / 2)
    grid_n = pl.cdiv(n, block_n)
    return block_n, tile_hw, grid_n, grid_hw


def mask_head_forward(x: jax.Array, w: jax.Array, b: jax.Array) -> jax.Array:
    """1x1 conv (MaskHead.forward). x: (N,C_in,H,W), w: (C_out,C_in), b: (C_out,)."""
    n, c_in, h, wdim = x.shape
    c_out = w.shape[0]
    hw = h * wdim
    itemsize = jnp.dtype(x.dtype).itemsize

    x3 = x.reshape(n, c_in, hw)                       # free reshape, lane-dense HW
    block_n, tile_hw, grid_n, grid_hw = _choose_tiling(n, c_in, c_out, hw, itemsize)
    grid = (grid_n, grid_hw)

    small = (c_in <= _SMALL_CHANNELS) and (c_out <= _SMALL_CHANNELS)
    if small:
        kernel = _mask_head_vpu_kernel
        w_arg = w.astype(jnp.float32)
        b_arg = b.astype(jnp.float32)
        w_spec = pl.BlockSpec(memory_space=pltpu.MemorySpace.SMEM)
        b_spec = pl.BlockSpec(memory_space=pltpu.MemorySpace.SMEM)
    else:
        kernel = _mask_head_mxu_kernel
        w_arg = w
        b_arg = b.reshape(c_out, 1)
        w_spec = pl.BlockSpec((c_out, c_in), lambda i, j: (0, 0))
        b_spec = pl.BlockSpec((c_out, 1), lambda i, j: (0, 0))

    # Full double-buffered footprint -> explicit, generation-safe VMEM limit.
    x_block = block_n * c_in * tile_hw * itemsize
    o_block = block_n * c_out * tile_hw * itemsize
    wb_bytes = (c_out * c_in + c_out) * 4
    footprint = 2 * (x_block + o_block) + wb_bytes + (1 << 20)
    vmem_limit = int(min(max(footprint, 16 << 20), 48 << 20))

    cost = pl.CostEstimate(
        flops=2 * n * c_out * c_in * hw,
        transcendentals=0,
        bytes_accessed=(c_in + c_out) * n * hw * itemsize + wb_bytes,
    )

    out = pl.pallas_call(
        kernel,
        out_shape=jax.ShapeDtypeStruct((n, c_out, hw), x.dtype),
        grid_spec=pltpu.PrefetchScalarGridSpec(
            num_scalar_prefetch=0,
            grid=grid,
            in_specs=[
                w_spec,
                b_spec,
                # TODO(synk): if profiling shows exposed DMA, add
                # pipeline_mode=pl.Buffered(3) here (re-check v7x VMEM budget).
                pl.BlockSpec((block_n, c_in, tile_hw), lambda i, j: (i, 0, j)),
            ],
            out_specs=pl.BlockSpec((block_n, c_out, tile_hw),
                                   lambda i, j: (i, 0, j)),
        ),
        compiler_params=pltpu.CompilerParams(
            dimension_semantics=("parallel", "parallel"),
            vmem_limit_bytes=vmem_limit,
        ),
        cost_estimate=cost,
    )(w_arg, b_arg, x3)

    return out.reshape(n, c_out, h, wdim)


if __name__ == "__main__":
    key = jax.random.PRNGKey(0)
    k1, k2, k3, k4, k5, k6 = jax.random.split(key, 6)

    def _ref(x, w, b):
        return jnp.einsum("oc,nchw->nohw", w, x) + b[None, :, None, None]

    # Case 1: tiny channel counts (VPU/SMEM path): N=2, C_in=4, C_out=2, H=W=16.
    x1 = jax.random.normal(k1, (2, 4, 16, 16), dtype=jnp.float32)
    w1 = jax.random.normal(k2, (2, 4), dtype=jnp.float32) * 0.1
    b1 = jax.random.normal(k3, (2,), dtype=jnp.float32) * 0.1
    y1 = mask_head_forward(x1, w1, b1)
    jax.block_until_ready(y1)
    r1 = _ref(x1, w1, b1)
    assert y1.shape == r1.shape and y1.dtype == x1.dtype
    assert bool(jnp.allclose(y1, r1, atol=1e-2, rtol=1e-2)), (
        f"VPU path mismatch: {float(jnp.max(jnp.abs(y1 - r1)))}")

    # Case 2: larger channels, non-128-multiple H*W (=196), ragged batch block
    # (MXU path + cdiv-grid masking).
    x2 = jax.random.normal(k4, (3, 32, 14, 14), dtype=jnp.float32)
    w2 = jax.random.normal(k5, (32, 32), dtype=jnp.float32) * 0.1
    b2 = jax.random.normal(k6, (32,), dtype=jnp.float32) * 0.1
    y2 = mask_head_forward(x2, w2, b2)
    jax.block_until_ready(y2)
    r2 = _ref(x2, w2, b2)
    assert y2.shape == r2.shape and y2.dtype == x2.dtype
    assert bool(jnp.allclose(y2, r2, atol=1e-2, rtol=1e-2)), (
        f"MXU path mismatch: {float(jnp.max(jnp.abs(y2 - r2)))}")

    print("KERNEL_OK")
</pallas_src>

<mosaic_0001>
module attributes {stable_mosaic.version = 11 : i64} {
  func.func @_mask_head_vpu_kernel(%arg0: i32, %arg1: i32, %arg2: memref<2x4xf32, #tpu.memory_space<smem>>, %arg3: memref<2xf32, #tpu.memory_space<smem>>, %arg4: memref<1x4x256xf32, #tpu.memory_space<vmem>>, %arg5: memref<1x2x256xf32, #tpu.memory_space<vmem>>) attributes {dimension_semantics = [#tpu.dimension_semantics<parallel>, #tpu.dimension_semantics<parallel>], iteration_bounds = array<i64: 2, 1>, scalar_prefetch = 0 : i64, scratch_operands = 0 : i64, tpu.core_type = #tpu.core_type<tc>, window_params = [{transform_indices = @transform_0, window_bounds = array<i64: 2, 4>}, {transform_indices = @transform_1, window_bounds = array<i64: 2>}, {transform_indices = @transform_2, window_bounds = array<i64: 1, 4, 256>}, {transform_indices = @transform_3, window_bounds = array<i64: 1, 2, 256>}]} {
    %c0 = arith.constant 0 : index
    %c0_0 = arith.constant 0 : index
    %c0_1 = arith.constant 0 : index
    %0 = vector.load %arg4[%c0, %c0_0, %c0_1] : memref<1x4x256xf32, #tpu.memory_space<vmem>>, vector<1x4x256xf32>
    %1 = vector.extract_strided_slice %0 {offsets = [0, 0, 0], sizes = [1, 1, 256], strides = [1, 1, 1]} : vector<1x4x256xf32> to vector<1x1x256xf32>
    %2 = vector.shape_cast %1 : vector<1x1x256xf32> to vector<1x256xf32>
    %c0_2 = arith.constant 0 : index
    %c0_3 = arith.constant 0 : index
    %3 = memref.load %arg2[%c0_2, %c0_3] : memref<2x4xf32, #tpu.memory_space<smem>>
    %4 = vector.broadcast %3 : f32 to vector<1x256xf32>
    %5 = arith.mulf %2, %4 : vector<1x256xf32>
    %c0_4 = arith.constant 0 : index
    %6 = memref.load %arg3[%c0_4] : memref<2xf32, #tpu.memory_space<smem>>
    %7 = vector.broadcast %6 : f32 to vector<1x256xf32>
    %8 = arith.addf %5, %7 : vector<1x256xf32>
    %9 = vector.extract_strided_slice %0 {offsets = [0, 1, 0], sizes = [1, 1, 256], strides = [1, 1, 1]} : vector<1x4x256xf32> to vector<1x1x256xf32>
    %10 = vector.shape_cast %9 : vector<1x1x256xf32> to vector<1x256xf32>
    %c0_5 = arith.constant 0 : index
    %c1 = arith.constant 1 : index
    %11 = memref.load %arg2[%c0_5, %c1] : memref<2x4xf32, #tpu.memory_space<smem>>
    %12 = vector.broadcast %11 : f32 to vector<1x256xf32>
    %13 = arith.mulf %10, %12 : vector<1x256xf32>
    %14 = arith.addf %8, %13 : vector<1x256xf32>
    %15 = vector.extract_strided_slice %0 {offsets = [0, 2, 0], sizes = [1, 1, 256], strides = [1, 1, 1]} : vector<1x4x256xf32> to vector<1x1x256xf32>
    %16 = vector.shape_cast %15 : vector<1x1x256xf32> to vector<1x256xf32>
    %c0_6 = arith.constant 0 : index
    %c2 = arith.constant 2 : index
    %17 = memref.load %arg2[%c0_6, %c2] : memref<2x4xf32, #tpu.memory_space<smem>>
    %18 = vector.broadcast %17 : f32 to vector<1x256xf32>
    %19 = arith.mulf %16, %18 : vector<1x256xf32>
    %20 = arith.addf %14, %19 : vector<1x256xf32>
    %21 = vector.extract_strided_slice %0 {offsets = [0, 3, 0], sizes = [1, 1, 256], strides = [1, 1, 1]} : vector<1x4x256xf32> to vector<1x1x256xf32>
    %22 = vector.shape_cast %21 : vector<1x1x256xf32> to vector<1x256xf32>
    %c0_7 = arith.constant 0 : index
    %c3 = arith.constant 3 : index
    %23 = memref.load %arg2[%c0_7, %c3] : memref<2x4xf32, #tpu.memory_space<smem>>
    %24 = vector.broadcast %23 : f32 to vector<1x256xf32>
    %25 = arith.mulf %22, %24 : vector<1x256xf32>
    %26 = arith.addf %20, %25 : vector<1x256xf32>
    %27 = vector.extract_strided_slice %0 {offsets = [0, 0, 0], sizes = [1, 1, 256], strides = [1, 1, 1]} : vector<1x4x256xf32> to vector<1x1x256xf32>
    %28 = vector.shape_cast %27 : vector<1x1x256xf32> to vector<1x256xf32>
    %c1_8 = arith.constant 1 : index
    %c0_9 = arith.constant 0 : index
    %29 = memref.load %arg2[%c1_8, %c0_9] : memref<2x4xf32, #tpu.memory_space<smem>>
    %30 = vector.broadcast %29 : f32 to vector<1x256xf32>
    %31 = arith.mulf %28, %30 : vector<1x256xf32>
    %c1_10 = arith.constant 1 : index
    %32 = memref.load %arg3[%c1_10] : memref<2xf32, #tpu.memory_space<smem>>
    %33 = vector.broadcast %32 : f32 to vector<1x256xf32>
    %34 = arith.addf %31, %33 : vector<1x256xf32>
    %35 = vector.extract_strided_slice %0 {offsets = [0, 1, 0], sizes = [1, 1, 256], strides = [1, 1, 1]} : vector<1x4x256xf32> to vector<1x1x256xf32>
    %36 = vector.shape_cast %35 : vector<1x1x256xf32> to vector<1x256xf32>
    %c1_11 = arith.constant 1 : index
    %c1_12 = arith.constant 1 : index
    %37 = memref.load %arg2[%c1_11, %c1_12] : memref<2x4xf32, #tpu.memory_space<smem>>
    %38 = vector.broadcast %37 : f32 to vector<1x256xf32>
    %39 = arith.mulf %36, %38 : vector<1x256xf32>
    %40 = arith.addf %34, %39 : vector<1x256xf32>
    %41 = vector.extract_strided_slice %0 {offsets = [0, 2, 0], sizes = [1, 1, 256], strides = [1, 1, 1]} : vector<1x4x256xf32> to vector<1x1x256xf32>
    %42 = vector.shape_cast %41 : vector<1x1x256xf32> to vector<1x256xf32>
    %c1_13 = arith.constant 1 : index
    %c2_14 = arith.constant 2 : index
    %43 = memref.load %arg2[%c1_13, %c2_14] : memref<2x4xf32, #tpu.memory_space<smem>>
    %44 = vector.broadcast %43 : f32 to vector<1x256xf32>
    %45 = arith.mulf %42, %44 : vector<1x256xf32>
    %46 = arith.addf %40, %45 : vector<1x256xf32>
    %47 = vector.extract_strided_slice %0 {offsets = [0, 3, 0], sizes = [1, 1, 256], strides = [1, 1, 1]} : vector<1x4x256xf32> to vector<1x1x256xf32>
    %48 = vector.shape_cast %47 : vector<1x1x256xf32> to vector<1x256xf32>
    %c1_15 = arith.constant 1 : index
    %c3_16 = arith.constant 3 : index
    %49 = memref.load %arg2[%c1_15, %c3_16] : memref<2x4xf32, #tpu.memory_space<smem>>
    %50 = vector.broadcast %49 : f32 to vector<1x256xf32>
    %51 = arith.mulf %48, %50 : vector<1x256xf32>
    %52 = arith.addf %46, %51 : vector<1x256xf32>
    %53 = vector.shape_cast %26 : vector<1x256xf32> to vector<1x1x256xf32>
    %54 = vector.shape_cast %52 : vector<1x256xf32> to vector<1x1x256xf32>
    %55 = tpu.concatenate %53, %54 in 1 : vector<1x1x256xf32>, vector<1x1x256xf32> -> vector<1x2x256xf32>
    %c0_17 = arith.constant 0 : index
    %c0_18 = arith.constant 0 : index
    %c0_19 = arith.constant 0 : index
    %56 = vector.load %arg5[%c0_17, %c0_18, %c0_19] : memref<1x2x256xf32, #tpu.memory_space<vmem>>, vector<1x2x256xf32>
    tpu.vector_store %arg5[%c0_17, %c0_18, %c0_19], %55 {strides = array<i32>} : memref<1x2x256xf32, #tpu.memory_space<vmem>>, vector<1x2x256xf32>,
    return
  }
  func.func @transform_0(%arg0: i32, %arg1: i32) -> (i32, i32) {
    %c0_i32 = arith.constant 0 : i32
    %c0_i32_0 = arith.constant 0 : i32
    %c0_i32_1 = arith.constant 0 : i32
    return %c0_i32, %c0_i32_0 : i32, i32
  }
  func.func @transform_1(%arg0: i32, %arg1: i32) -> i32 {
    %c0_i32 = arith.constant 0 : i32
    %c0_i32_0 = arith.constant 0 : i32
    return %c0_i32 : i32
  }
  func.func @transform_2(%arg0: i32, %arg1: i32) -> (i32, i32, i32) {
    %c0_i32 = arith.constant 0 : i32
    %c0_i32_0 = arith.constant 0 : i32
    return %arg0, %c0_i32, %arg1 : i32, i32, i32
  }
  func.func @transform_3(%arg0: i32, %arg1: i32) -> (i32, i32, i32) {
    %c0_i32 = arith.constant 0 : i32
    %c0_i32_0 = arith.constant 0 : i32
    return %arg0, %c0_i32, %arg1 : i32, i32, i32
  }
}

</mosaic_0001>

<bundles_post_ra>
// kernel: tpu_custom_call.1
= control target key start
LH: loop header
LB: loop body
LE: loop exit
PB: predicated region body
PF: predicated region fallthrough
CT: control target
= control target key end

     0   :  { %8 = vsyncpa [#allocation5], 0  ;;  %s881_s0 = inlined_call_operand.hbm [shape: f32[2,4], index: 0, kind: input, shape index: {}]   ;;  %s882_s1 = inlined_call_operand.hbm [shape: f32[2], index: 1, kind: input, shape index: {}]   ;;  %s883_s2 = inlined_call_operand.hbm [shape: f32[2,4,256], index: 2, kind: input, shape index: {}]   ;;  %s884_s3 = inlined_call_operand.hbm [shape: f32[2,2,256], index: 3, kind: output, shape index: {}]  }
   0x1   :  { %9 = vsyncpa [#allocation7], 0 }
   0x2   :  { %10 = vsyncpa [#allocation3], 0 }
   0x3   :  { %12 = vsyncpa [#allocation3 + $0x1], 0 }
   0x4   :  { %13 = vsyncpa [#allocation4], 0 }
   0x5   :  { %15 = vsyncpa [#allocation4 + $0x1], 0  ;;  %s734_s12 = smov 0   ;;  %s736_s13 = smov 0  }
   0x6   :  { %s738_s14 = smov 0   ;;  %s740_s15 = smov 0  }
   0x7   :  { %s742_s16 = smov 0   ;;  %s744_s17 = smov 0  }
   0x8 LB: > { %s442_s18 = sadd.s32 4294967295, %s710_s17   ;;  %s443_s19 = sadd.s32 4294967294, %s710_s17   ;;  %s710_s17 = sphi %s744_s17, %s21_s17   ;;  %s706_s16 = sphi %s742_s16, %s894_s16   ;;  %s702_s15 = sphi %s740_s15, %s893_s15   ;;  %s698_s14 = sphi %s738_s14, %s892_s14   ;;  %s694_s13 = sphi %s736_s13, %s891_s13   ;;  %s690_s12 = sphi %s734_s12, %s890_s12  }
   0x9   : > { %p97_p0 = scmp.ne.s32.totalorder %s694_s13, %s690_s12  ;;  %p768_p1 = scmp.eq.s32.totalorder %s442_s18, 0 }
   0xa   : > { %p129_p2 = scmp.eq.s32.totalorder %s443_s19, 1  ;;  %p444_p4 = scmp.ge.s32.totalorder %s710_s17, 1 }
   0xb   : > { %p774_p3 = por %p768_p1, %p97_p0  ;;  %p136_p6 = scmp.lt.s32.totalorder %s710_s17, 3 }
   0xc   : > { %p779_p5 = por %p129_p2, %p97_p0  ;;  %s148_s25 = sshll.u32 %s881_s0, 4  ;;  %s149_s25 = int_to_ptr.hbm [resolvable:$true] %s148_s25 }
   0xd   : > { %p787_p7 = pnand %p444_p4, %p136_p6  ;;  %p447_p8 = scmp.ge.s32.totalorder %s710_s17, 2 }
   0xe   : > { %s158_s29 = sshll.u32 %s882_s1, 4  ;;  %s712_s30 = smov [#allocation2]   ;;  %s159_s29 = int_to_ptr.hbm [resolvable:$true] %s158_s29 }
   0xf   : > { %p489_p9 = pneg %p787_p7  ;;  %s713_s4 = smov [#allocation6]  }
  0x10   : > { %p123_p11 = scmp.eq.s32.totalorder %s442_s18, 1  ;;  %s33_s5 = sadd.s32 1, %s706_s16 }
  0x11   : > { %p490_p10 = pnand %p489_p9, %p768_p1  ;;  %p35_p12 = scmp.ge.s32.totalorder %s33_s5, 2 }
  0x12   : > { %s84_s6 = sadd.s32 1, %s698_s14  ;;  %p91_p13 = scmp.ne.s32.totalorder %s698_s14, %s694_s13 }
  0x13   : > { %492 = dma.hbm_to_smem (!%p490_p10), %s149_s25, 32, %s712_s30, [#allocation5]  }
  0x14   : > { %495 = dma.hbm_to_smem (!%p490_p10), %s159_s29, 16, %s713_s4, [#allocation7]  }
  0x15   : > { %p92_p0 = scmp.eq.s32.totalorder %s710_s17, 0  ;;  %s896_s5 = smov (%p35_p12, %s33_s5), 0 }
  0x16   : > { %p806_p2 = por %p123_p11, %p91_p13  ;;  %p506_p4 = scmp.lt.s32.totalorder %s710_s17, 2 }
  0x17   : > { %s79_s8 = ssub.s32 %s706_s16, %s896_s5  ;;  %s169_s9 = sand.u32 1, %s698_s14  }
  0x18   : > { %p82_p6 = scmp.eq.s32.totalorder %s79_s8, 0  ;;  %p93_p9 = por %p92_p0, %p91_p13 }
  0x19   : > { %s448_s10 = sshll.u32 %s169_s9, 3  ;;  %s475_s11 = sshll.u32 %s706_s16, 3 }
  0x1a   : > { %s816_s18 = scalar_select %p82_p6, %s698_s14, %s84_s6  }
  0x1b   : > { %s180_s24 = scalar_lea.hbm %s883_s2, %s475_s11  ;;  %s173_s27 = scalar_lea.vmem [#allocation8], %s448_s10 }
  0x1c   : > { %s182_s25 = sshll.u32 %s180_s24, 4  ;;  %s184_s28 = sshll.u32 %s173_s27, 4  ;;  %s183_s25 = int_to_ptr.hbm [resolvable:$true] %s182_s25  ;;  %s185_s28 = int_to_ptr.vmem [resolvable:$true] %s184_s28 }
  0x1d   : > { %p497_p10 = pnand %p506_p4, %p93_p9  ;;  %s170_s29 = scalar_lea.sflag [#allocation3], %s169_s9 }
  0x1e   : > { %193 = sbr.rel (%p787_p7) target bundleno = 77 (0x4d), region = 32 }
  0x1f   : > { %499 = dma.hbm_to_vmem [thread:$0]  (!%p497_p10), %s183_s25, 128, %s185_s28, %s170_s29  }
  0x23   : > { %673 = dma.done.wait (%p768_p1), [#allocation5], 32  }
  0x24   : > { %675 = vsyncadd (%p768_p1), [#allocation5], 4294967264 }
  0x25   : > { %677 = dma.done.wait (%p768_p1), [#allocation7], 16  }
  0x26   : > { %679 = vsyncadd (%p768_p1), [#allocation7], 4294967280  ;;  %s834_s30 = sand.u32 1, %s694_s13  }
  0x27   : > { %s454_s26 = sshll.u32 %s834_s30, 3  ;;  %s206_s4 = scalar_lea.sflag [#allocation3], %s834_s30 }
  0x28   : > { %s209_s6 = scalar_lea.vmem [#allocation8], %s454_s26 }
  0x29   : > { %681 = dma.done.wait (%p774_p3), %s206_s4, 128  }
  0x2a   : > { %683 = vsyncadd (%p774_p3), %s206_s4, 4294967168 }
  0x2b   : > { %215 = sfence }
  0x2c   : > { %s237_s8 = sld [smem:[#allocation2]]  ;;  %v236_v0 = vld [vmem:[%s209_s6] sm:$0xff]  ;;  %s455_s27 = sshll.u32 %s834_s30, 2  ;;  %vm307_vm0 = vcmask 1040384   ;;  %vm313_vm1 = vcmask 1041408  }
  0x2d   : > { %s240_s9 = sld [smem:[#allocation6]]  ;;  %s476_s28 = sshll.u32 %s702_s15, 2 }
  0x2e   : > { %s456_s10 = sld [smem:[#allocation2 + $0x1]]  ;;  %s331_s4 = scalar_lea.hbm %s884_s3, %s476_s28 }
  0x2f   : > { %s458_s20 = sld [smem:[#allocation2 + $0x2]]  ;;  %s233_s6 = scalar_lea.vmem [#allocation9], %s455_s27 }
  0x30   : > { %s460_s11 = sld [smem:[#allocation2 + $0x3]]  ;;  %s318_s15 = scalar_lea.sflag [#allocation4], %s834_s30 }
  0x31   : > { %s462_s19 = sld [smem:[#allocation2 + $0x80]] }
  0x32   : > { %v238_v1 = vstv %s237_s8  ;;  %s463_s23 = sld [smem:[#allocation6 + $0x1]]  ;;  %s333_s8 = sshll.u32 %s233_s6, 4  ;;  %s334_s8 = int_to_ptr.vmem [resolvable:$true] %s333_s8 }
  0x33   : > { %v239_v2 = vmul.f32 %v238_v1, %v236_v0  ;;  %v241_v3 = vstv %s240_s9  ;;  %s464_s24 = sld [smem:[#allocation2 + $0x81]]  ;;  %s335_s9 = sshll.u32 %s331_s4, 4  ;;  %s336_s9 = int_to_ptr.hbm [resolvable:$true] %s335_s9 }
  0x34   : > { %v244_v4 = vstv %s456_s10  ;;  %s466_s25 = sld [smem:[#allocation2 + $0x82]]  ;;  %s634_s10 = sshra.s32 %s336_s9, 4  ;;  %s635_s10 = int_to_ptr.hbm [resolvable:$true] %s634_s10 }
  0x35   : > { %v242_v5 = vadd.f32 %v241_v3, %v239_v2  ;;  %v245_v6 = vmul.f32 %v244_v4, %v236_v0  ;;  %v252_v7 = vstv %s458_s20  ;;  %s468_s21 = sld [smem:[#allocation2 + $0x83]]  ;;  %s636_s20 = scalar_lea.hbm %s635_s10, 4 }
  0x36   : > { %v253_v8 = vmul.f32 %v252_v7, %v236_v0  ;;  %v260_v9 = vstv %s460_s11  ;;  %p637_p1 = scmp.ne.s32.totalorder %s635_s10, %s636_s20  ;;  %p641_p11 = scmp.lt.s32.totalorder %s635_s10, %s884_s3 }
  0x37   : > { %v457_v10 = vrot.slane %v245_v6, 9  ;;  %v261_v11 = vmul.f32 %v260_v9, %v236_v0  ;;  %v268_v12 = vstv %s462_s19 }
  0x38   : > { %v459_v13 = vrot.slane %v253_v8, 10  ;;  %v269_v14 = vmul.f32 %v268_v12, %v236_v0  ;;  %v271_v15 = vstv %s463_s23  ;;  %p638_p3 = pnand %p637_p1, %p806_p2  ;;  %s640_s23 = scalar_lea.hbm %s884_s3, 8 }
  0x39   : > { %v250_v16 = vadd.f32 %v457_v10, %v242_v5  ;;  %v274_v17 = vstv %s464_s24  ;;  %v461_v18 = vrot.slane %v261_v11, 11  ;;  %p642_p12 = scmp.lt.s32.totalorder %s640_s23, %s636_s20 }
  0x3a   : > { %v272_v19 = vadd.f32 %v271_v15, %v269_v14  ;;  %v275_v20 = vmul.f32 %v274_v17, %v236_v0  ;;  %v282_v21 = vstv %s466_s25  ;;  %p639_p7 = pneg %p638_p3 }
  0x3b   : > { %v258_v22 = vadd.f32 %v459_v13, %v250_v16  ;;  %v283_v23 = vmul.f32 %v282_v21, %v236_v0  ;;  %v290_v24 = vstv %s468_s21  ;;  %p643_p13 = por %p642_p12, %p641_p11 }
  0x3c   : > { %v465_v25 = vrot.slane %v275_v20, 9  ;;  %v291_v26 = vmul.f32 %v290_v24, %v236_v0 }
  0x3d   : > { %v467_v27 = vrot.slane %v283_v23, 10  ;;  %v266_v28 = vadd.f32 %v461_v18, %v258_v22  ;;  %p644_p0 = pnand %p643_p13, %p639_p7 }
  0x3e   : > { %v280_v29 = vadd.f32 %v465_v25, %v272_v19  ;;  %v469_v30 = vrot.slane %v291_v26, 11 }
  0x3f   : > { %v298_v33 = vperm.slane %v266_v28, 0  ;;  %v299_v34 = vperm.slane %v266_v28, 4 }
  0x40   : > { %v288_v31 = vadd.f32 %v467_v27, %v280_v29 }
  0x42   : > { %v296_v32 = vadd.f32 %v469_v30, %v288_v31 }
  0x44   : > { %v303_v35 = vperm.slane %v296_v32, 0  ;;  %v304_v36 = vperm.slane %v296_v32, 4 }
  0x46   : > { %v308_v37 = vsel %vm307_vm0, %v298_v33, %v303_v35  ;;  %v309_v38 = vsel %vm307_vm0, %v299_v34, %v304_v36 }
  0x47   : > { %v312_v39 = vrot.slane %v309_v38, 6 }
  0x49   : > { %v314_v40 = vsel %vm313_vm1, %v308_v37, %v312_v39 }
  0x4a   : > { %316 = vst [vmem:[%s233_s6] sm:$0xf] %v314_v40 }
  0x4b   : > { %647 = shalt.err (!%p644_p0)
}
  0x4c   : > { %487 = dma.vmem_to_hbm [thread:$0]  (%p806_p2), %s334_s8, 64, %s336_s9, %s318_s15  }
  0x4d PF: > { %s347_s30 = sand.u32 1, %s690_s12   ;;  %p501_p4 = pnand %p447_p8, %p779_p5 }
  0x4e   : > { %s348_s21 = scalar_lea.sflag [#allocation4], %s347_s30 }
  0x4f   : > { %p502_p6 = pneg %p501_p4 }
  0x51   : > { %685 = dma.done.wait (%p502_p6), %s348_s21, 64  }
  0x52   : > { %687 = vsyncadd (%p502_p6), %s348_s21, 4294967232  ;;  %s21_s17 = sadd.s32 1, %s710_s17   ;;  %s890_s12 = smov %s694_s13 }
  0x53   : > { %p18_p9 = scmp.ge.s32.totalorder %s21_s17, 4   ;;  %s891_s13 = smov %s698_s14 }
  0x54   : > { %s892_s14 = smov %s816_s18  ;;  %s893_s15 = smov %s706_s16 }
  0x55   : > { %s894_s16 = smov %s896_s5  ;;  %20 = sbr.rel (!%p18_p9) target bundleno = 8 (0x8), region = 86 }
  0x5a   :  { %354 = vsyncpa [#allocation3], 1 }
  0x5b   :  { %356 = vsyncpa [#allocation3 + $0x1], 1 }
  0x5c   :  { %357 = vsyncpa [#allocation4], 1 }
  0x5d   :  { %359 = vsyncpa [#allocation4 + $0x1], 1 }
  0x5e   :  { %360 = vsyncpa [#allocation5], 1 }
  0x5f   :  { %362 = vsyncpa [#allocation5 + $0x1], 1 }
  0x60   :  { %363 = vsyncpa [#allocation7], 1 }

</bundles_post_ra>
